<compile_context>
chip_gen: v7x
topology: tpu7x:2x2x1
jax: 0.10.0
libtpu: 0.0.40
codegen_flags: <defaults>
</compile_context>

<pallas_src>
import functools
import math

import jax
import jax.numpy as jnp
from jax.experimental import pallas as pl
from jax.experimental.pallas import tpu as pltpu

EPS = float(jnp.finfo(jnp.float32).eps)   # == torch.finfo(torch.float32).eps
BN_EPS = 1e-5                             # PyTorch BatchNorm default eps


# ----------------------------- small helpers --------------------------------

def _round_up(n, m):
    return ((n + m - 1) // m) * m


def _pick_tile(n, target, align):
    """Largest divisor of n that is <= target and a multiple of `align`; else the full dim."""
    for d in range(min(target, n), 0, -1):
        if n % d == 0 and d % align == 0:
            return d
    return n   # full dim is always a legal block extent


# ----------------------------- Pallas kernels ------------------------------

def mag_conv_f_kernel(r_ref, i_ref, w_ref, s_ref, b_ref, o_ref, *, kh, pf, f_out):
    # One (batch, time-tile) grid point.  Fuses |STFT| magnitude + clamp with the first
    # frequency-only Conv2dBlock (Cin=1, kernel (kh,1)) + BatchNorm + ReLU.  The conv runs as
    # kh shifted broadcast-MACs (7 MACs / output element -- negligible next to the 5x5x64x64
    # blocks), so no HBM intermediate and no degenerate channel-dim-1 layout.
    r = r_ref[0]                                                  # (F_pad, t_tile)
    im = i_ref[0]
    y = jnp.maximum(jnp.sqrt(r * r + im * im), EPS)               # clamp(|r + i*j|, EPS)
    # zero the frequency halo: PyTorch 'same' conv pads y with zeros (not EPS)
    f_idx = jax.lax.broadcasted_iota(jnp.int32, y.shape, 0)
    y = jnp.where((f_idx >= pf) & (f_idx < pf + f_out), y, 0.0)

    t_tile = y.shape[1]
    cout = w_ref.shape[1]
    acc = jnp.zeros((f_out, t_tile, cout), jnp.float32)
    for a in range(kh):
        acc = acc + y[a:a + f_out, :, None] * w_ref[a][None, None, :]

    # fused conv-bias + BatchNorm (running stats) + ReLU
    out = jnp.maximum(acc * s_ref[0] + b_ref[0], 0.0)
    o_ref[0] = out.astype(o_ref.dtype)


def conv_bn_relu_kernel(x_hbm, w_ref, s_ref, b_ref, o_ref, x_vmem, sem,
                        *, kh, kw, df, dt, f_out, t_tile, cin, cout):
    # One (batch, time-tile) grid point.  Manually DMA the padded input window
    # (F_pad, t_tile + (kw-1)*dt, cin) from HBM into VMEM, then accumulate kh*kw shifted
    # (F*t_tile, cin) x (cin, cout) matmuls (im2col fused, never materialized in HBM).
    b = pl.program_id(0)
    ti = pl.program_id(1)
    t_win = t_tile + (kw - 1) * dt

    cp = pltpu.make_async_copy(
        x_hbm.at[b, :, pl.ds(ti * t_tile, t_win), :], x_vmem, sem)
    cp.start()
    cp.wait()

    m = f_out * t_tile
    acc = jnp.zeros((m, cout), jnp.float32)
    for a in range(kh):
        for c in range(kw):
            slab = x_vmem[pl.ds(a * df, f_out), pl.ds(c * dt, t_tile), :]
            slab = slab.reshape(m, cin)
            acc = acc + jnp.dot(slab, w_ref[a * kw + c],
                                preferred_element_type=jnp.float32)

    # fused conv-bias + BatchNorm (running stats) + ReLU
    y = jnp.maximum(acc * s_ref[...] + b_ref[...], 0.0)
    o_ref[0] = y.reshape(f_out, t_tile, cout).astype(o_ref.dtype)


def emb_proj_kernel(e_ref, w1_ref, b1_ref, w2_ref, b2_ref, o_ref):
    # Matches the PyTorch reference exactly:  e = (e + EPS) / ||e + EPS||_2  (elementwise add
    # of EPS is what the reference does), then linear1_emb -> linear2_emb (no nonlinearity).
    e = e_ref[...] + EPS
    nrm = jnp.sqrt(jnp.sum(e * e, axis=1, keepdims=True))
    e = e / nrm
    h = jnp.dot(e, w1_ref[...], preferred_element_type=jnp.float32) + b1_ref[...]
    o_ref[...] = jnp.dot(h, w2_ref[...], preferred_element_type=jnp.float32) + b2_ref[...]


def xproj_kernel(y_ref, e_ref, w_ref, b_ref, o_ref, *, hp4):
    # Fused:  f = y * e_trans   and the (batch-parallel) LSTM input projection for all 4 gates
    #         xw = f @ Wih_cat + (b_ih + b_hh)
    bsz, tt, din = y_ref.shape
    f = y_ref[...].astype(jnp.float32) * e_ref[...][:, None, :]
    f = f.astype(w_ref.dtype).reshape(bsz * tt, din)
    xw = jnp.dot(f, w_ref[...], preferred_element_type=jnp.float32) + b_ref[...]
    o_ref[...] = xw.reshape(bsz, tt, hp4)


def lstm_kernel(xw_ref, whh_ref, o_ref, h_sc, c_sc, *, hp, chunk):
    # Recurrent part only: per timestep a single (B, Hp) x (Hp, 4Hp) matmul; gate order
    # (i, f, g, o) concatenated on lane-aligned Hp boundaries.  `chunk` timesteps per grid step.
    @pl.when(pl.program_id(0) == 0)
    def _init():
        h_sc[...] = jnp.zeros_like(h_sc)
        c_sc[...] = jnp.zeros_like(c_sc)

    whh = whh_ref[...]
    for s in range(chunk):
        gates = xw_ref[:, s, :] + jnp.dot(h_sc[...], whh,
                                          preferred_element_type=jnp.float32)
        i_g = jax.nn.sigmoid(gates[:, 0 * hp:1 * hp])
        f_g = jax.nn.sigmoid(gates[:, 1 * hp:2 * hp])
        g_g = jnp.tanh(gates[:, 2 * hp:3 * hp])
        o_g = jax.nn.sigmoid(gates[:, 3 * hp:4 * hp])
        c = f_g * c_sc[...] + i_g * g_g
        h = o_g * jnp.tanh(c)
        c_sc[...] = c
        h_sc[...] = h
        o_ref[:, s, :] = h.astype(o_ref.dtype)


def mask_head_kernel(h_ref, w1_ref, b1_ref, w2_ref, b2_ref, r_ref, i_ref,
                     m_ref, ro_ref, io_ref):
    # mask head: Linear -> ReLU -> Linear, frontend non_linear (relu), then fused mask apply:
    #   m * mag * cos(atan2(i, r)) == m * r     m * mag * sin(atan2(i, r)) == m * i
    h = jnp.dot(h_ref[...], w1_ref[...], preferred_element_type=jnp.float32) + b1_ref[...]
    h = jnp.maximum(h, 0.0)
    m = jnp.dot(h, w2_ref[...], preferred_element_type=jnp.float32) + b2_ref[...]
    m = jnp.maximum(m, 0.0)
    m_ref[...] = m
    ro_ref[...] = m * r_ref[...]
    io_ref[...] = m * i_ref[...]


# ----------------------------- Pallas wrappers ------------------------------

def _mag_conv_f(r, i, w, scale, bias, kh, pf, t_tile, out_dtype):
    """r, i: (B, F, T).  Fused magnitude + cnn_f.  Returns (B, F, T, Cout) channel-last."""
    B, F, T = r.shape
    cout = w.shape[1]
    rp = jnp.pad(r, ((0, 0), (pf, pf), (0, 0)))
    ip = jnp.pad(i, ((0, 0), (pf, pf), (0, 0)))
    F_pad = F + 2 * pf
    nt = T // t_tile

    kernel = functools.partial(mag_conv_f_kernel, kh=kh, pf=pf, f_out=F)
    in_spec = pl.BlockSpec((1, F_pad, t_tile), lambda b, t: (b, 0, t))
    return pl.pallas_call(
        kernel,
        out_shape=jax.ShapeDtypeStruct((B, F, T, cout), out_dtype),
        grid=(B, nt),
        in_specs=[in_spec, in_spec,
                  pl.BlockSpec((kh, cout), lambda b, t: (0, 0)),
                  pl.BlockSpec((1, cout), lambda b, t: (0, 0)),
                  pl.BlockSpec((1, cout), lambda b, t: (0, 0))],
        out_specs=pl.BlockSpec((1, F, t_tile, cout), lambda b, t: (b, 0, t, 0)),
        compiler_params=pltpu.CompilerParams(
            dimension_semantics=("parallel", "parallel")),
    )(rp, ip, w, scale, bias)


def _conv_bn_relu(x, w_taps, scale, bias, kh, kw, df, dt, t_tile):
    """x: (B, F, T, Cin) channel-last activation.  Returns (B, F, T, Cout)."""
    B, F, T, Cin = x.shape
    Cout = w_taps.shape[-1]
    pf = df * (kh - 1) // 2
    pt = dt * (kw - 1) // 2
    xp = jnp.pad(x, ((0, 0), (pf, pf), (pt, pt), (0, 0)))   # PyTorch-style zero 'same' padding
    F_pad = F + 2 * pf
    t_win = t_tile + (kw - 1) * dt
    nt = T // t_tile

    kernel = functools.partial(conv_bn_relu_kernel, kh=kh, kw=kw, df=df, dt=dt,
                               f_out=F, t_tile=t_tile, cin=Cin, cout=Cout)
    return pl.pallas_call(
        kernel,
        out_shape=jax.ShapeDtypeStruct((B, F, T, Cout), x.dtype),
        grid=(B, nt),
        in_specs=[
            pl.BlockSpec(memory_space=pl.ANY),                          # padded input (manual DMA)
            pl.BlockSpec((kh * kw, Cin, Cout), lambda b, t: (0, 0, 0)),  # resident weights
            pl.BlockSpec((1, Cout), lambda b, t: (0, 0)),
            pl.BlockSpec((1, Cout), lambda b, t: (0, 0)),
        ],
        out_specs=pl.BlockSpec((1, F, t_tile, Cout), lambda b, t: (b, 0, t, 0)),
        scratch_shapes=[pltpu.VMEM((F_pad, t_win, Cin), x.dtype),
                        pltpu.SemaphoreType.DMA],
        compiler_params=pltpu.CompilerParams(
            dimension_semantics=("parallel", "parallel")),
    )(xp, w_taps, scale, bias)


def _emb_proj(e, w1, b1, w2, b2):
    B = e.shape[0]
    din = w2.shape[1]
    return pl.pallas_call(
        emb_proj_kernel,
        out_shape=jax.ShapeDtypeStruct((B, din), jnp.float32),
    )(e, w1, b1, w2, b2)


def _xproj(y_t, e_trans, wih, b, t_tile, hp4):
    B, T, Din = y_t.shape
    nt = T // t_tile
    kernel = functools.partial(xproj_kernel, hp4=hp4)
    return pl.pallas_call(
        kernel,
        out_shape=jax.ShapeDtypeStruct((B, T, hp4), jnp.float32),
        grid=(nt,),
        in_specs=[pl.BlockSpec((B, t_tile, Din), lambda t: (0, t, 0)),
                  pl.BlockSpec((B, Din), lambda t: (0, 0)),
                  pl.BlockSpec((Din, hp4), lambda t: (0, 0)),
                  pl.BlockSpec((1, hp4), lambda t: (0, 0))],
        out_specs=pl.BlockSpec((B, t_tile, hp4), lambda t: (0, t, 0)),
        compiler_params=pltpu.CompilerParams(dimension_semantics=("parallel",)),
    )(y_t, e_trans, wih, b)


def _lstm(xw, whh, hp, chunk):
    B, T, hp4 = xw.shape
    nc = T // chunk
    kernel = functools.partial(lstm_kernel, hp=hp, chunk=chunk)
    return pl.pallas_call(
        kernel,
        out_shape=jax.ShapeDtypeStruct((B, T, hp), jnp.float32),
        grid=(nc,),
        in_specs=[pl.BlockSpec((B, chunk, hp4), lambda t: (0, t, 0)),
                  pl.BlockSpec((hp, hp4), lambda t: (0, 0))],
        out_specs=pl.BlockSpec((B, chunk, hp), lambda t: (0, t, 0)),
        scratch_shapes=[pltpu.VMEM((B, hp), jnp.float32),
                        pltpu.VMEM((B, hp), jnp.float32)],
        compiler_params=pltpu.CompilerParams(dimension_semantics=("arbitrary",)),
    )(xw, whh)


def _mask_head(h_rows, w1, b1, w2, b2, r_rows, i_rows, row_tile):
    R, hp = h_rows.shape
    lp = w1.shape[1]
    nb = w2.shape[1]
    nr = R // row_tile
    row_spec = pl.BlockSpec((row_tile, nb), lambda r: (r, 0))
    return pl.pallas_call(
        mask_head_kernel,
        out_shape=(jax.ShapeDtypeStruct((R, nb), jnp.float32),
                   jax.ShapeDtypeStruct((R, nb), jnp.float32),
                   jax.ShapeDtypeStruct((R, nb), jnp.float32)),
        grid=(nr,),
        in_specs=[pl.BlockSpec((row_tile, hp), lambda r: (r, 0)),
                  pl.BlockSpec((hp, lp), lambda r: (0, 0)),
                  pl.BlockSpec((1, lp), lambda r: (0, 0)),
                  pl.BlockSpec((lp, nb), lambda r: (0, 0)),
                  pl.BlockSpec((1, nb), lambda r: (0, 0)),
                  row_spec, row_spec],
        out_specs=(row_spec, row_spec, row_spec),
        compiler_params=pltpu.CompilerParams(dimension_semantics=("parallel",)),
    )(h_rows, w1, b1, w2, b2, r_rows, i_rows)


# ----------------------------- parameter init ------------------------------

def init_params(key, num_bins, emb_dim=256, lstm_dim=400, linear_dim=600,
                compute_dtype=jnp.bfloat16):
    ks = iter(jax.random.split(key, 128))

    def nrm(shape, scale):
        return scale * jax.random.normal(next(ks), shape, jnp.float32)

    def bn_fuse(cout, b_conv):
        # inference-mode BatchNorm fused with the conv bias into per-channel scale/bias
        gamma = 1.0 + nrm((cout,), 0.1)
        beta = nrm((cout,), 0.1)
        run_mean = nrm((cout,), 0.1)
        run_var = 1.0 + 0.1 * jnp.abs(nrm((cout,), 1.0))
        scale = gamma / jnp.sqrt(run_var + BN_EPS)
        bias = (b_conv - run_mean) * scale + beta
        return scale.reshape(1, cout), bias.reshape(1, cout)

    # cnn_f (fused with |STFT| magnitude in its own kernel): Conv(1->64, (7,1))
    kh_f, cout_f = 7, 64
    w_f = nrm((cout_f, 1, kh_f, 1), 1.0 / math.sqrt(kh_f))        # torch conv weight layout
    s_f, b_f = bn_fuse(cout_f, nrm((cout_f,), 0.05))
    conv_f = dict(w=jnp.transpose(w_f, (2, 3, 1, 0)).reshape(kh_f, cout_f),   # (kh, cout) f32
                  scale=s_f, bias=b_f, kh=kh_f, pf=(kh_f - 1) // 2)

    # cnn_t, 5x cnn_tf (time-dilated), proj -- as in Frontend.__init__
    conv_cfgs = ([dict(cin=64, cout=64, kh=1, kw=7, df=1, dt=1)]
                 + [dict(cin=64, cout=64, kh=5, kw=5, df=1, dt=2 ** d) for d in range(5)]
                 + [dict(cin=64, cout=8, kh=1, kw=1, df=1, dt=1)])

    blocks = []
    for cfg in conv_cfgs:
        cin, cout, kh, kw = cfg["cin"], cfg["cout"], cfg["kh"], cfg["kw"]
        fan_in = cin * kh * kw
        w = nrm((cout, cin, kh, kw), 1.0 / math.sqrt(fan_in))      # torch conv weight layout
        scale, bias = bn_fuse(cout, nrm((cout,), 0.05))
        # taps laid out as (kh*kw, cin, cout) matching the in-kernel (a, c) accumulation order
        w_taps = jnp.transpose(w, (2, 3, 1, 0)).reshape(kh * kw, cin, cout)
        blocks.append(dict(w=w_taps.astype(compute_dtype), scale=scale, bias=bias,
                           kh=kh, kw=kw, df=cfg["df"], dt=cfg["dt"]))

    din = 8 * num_bins
    H, Hp = lstm_dim, _round_up(lstm_dim, 128)
    L, Lp = linear_dim, _round_up(linear_dim, 128)

    def pad_cols(x, n):
        return jnp.pad(x, ((0, 0), (0, n - x.shape[1])))

    def pad_rows(x, n):
        return jnp.pad(x, ((0, n - x.shape[0]), (0, 0)))

    # LSTM gate order (i, f, g, o); hidden dim zero-padded to Hp (multiple of 128) -- the
    # padded units carry exactly zero state/output, so numerics are unchanged.
    wih = jnp.concatenate(
        [pad_cols(nrm((din, H), 1.0 / math.sqrt(H)), Hp) for _ in range(4)], axis=1)
    whh = jnp.concatenate(
        [pad_cols(pad_rows(nrm((H, H), 1.0 / math.sqrt(H)), Hp), Hp) for _ in range(4)], axis=1)
    b_l = jnp.concatenate(
        [pad_cols(nrm((1, H), 1.0 / math.sqrt(H)), Hp) for _ in range(4)], axis=1)  # b_ih + b_hh

    return dict(
        conv_f=conv_f,
        conv_blocks=blocks,
        emb_w1=nrm((emb_dim, 128), 1.0 / math.sqrt(emb_dim)),
        emb_b1=nrm((1, 128), 0.05),
        emb_w2=nrm((128, din), 1.0 / math.sqrt(128)),
        emb_b2=nrm((1, din), 0.05),
        lstm_wih=wih.astype(compute_dtype),
        lstm_whh=whh,
        lstm_b=b_l,
        mask_w1=pad_cols(pad_rows(nrm((H, L), 1.0 / math.sqrt(H)), Hp), Lp),
        mask_b1=pad_cols(nrm((1, L), 0.05), Lp),
        mask_w2=pad_rows(nrm((L, num_bins), 1.0 / math.sqrt(L)), Lp),
        mask_b2=nrm((1, num_bins), 0.05),
        dims=dict(H=H, Hp=Hp, L=L, Lp=Lp, din=din, num_bins=num_bins),
        compute_dtype=compute_dtype,
    )


# ----------------------------- forward pass ---------------------------------

def frontend_forward(params, r, i, e, max_norm, return_mask=False,
                     conv_t_tile=128, lstm_chunk=16, mlp_row_tile=512):
    """r, i: (B, F, T) real/imag spectrogram; e: (B, D) speaker embedding.

    Tile-size notes: conv_t_tile=128 / mlp_row_tile=512 target v5e/v6e VMEM budgets; halve
    them (64 / 256) on v7x where VMEM is 64 MiB physical / 32 MiB default-scoped.
    """
    del max_norm  # only used by the (unimplemented) iSTFT / peak-normalization tail
    if e.ndim == 1:
        e = e[None, :]
    B, F, T = r.shape
    dims = params["dims"]
    cdt = params["compute_dtype"]

    # fused |STFT| magnitude + clamp + cnn_f (Conv(1->64,(7,1)) + BN + ReLU), channel-last out.
    # This block's input blocks have the time tile in the lane dim -> tile must be a multiple
    # of 128 or the full T; the remaining conv blocks only need multiples of 8 (sublane dim).
    cf = params["conv_f"]
    t_tile_f = _pick_tile(T, conv_t_tile, 128)
    x = _mag_conv_f(r, i, cf["w"], cf["scale"], cf["bias"],
                    cf["kh"], cf["pf"], t_tile_f, cdt)               # (B, F, T, 64)

    # remaining CNN stack, channel-last (B, F, T, C), im2col fused in-kernel, time-tiled
    t_tile = _pick_tile(T, conv_t_tile, 8)
    for blk in params["conv_blocks"]:
        x = _conv_bn_relu(x, blk["w"], blk["scale"], blk["bias"],
                          blk["kh"], blk["kw"], blk["df"], blk["dt"], t_tile)

    # y.view(B, -1, T).transpose(1, 2)  -> (B, T, 8F) with feature order (channel*F + freq)
    y_t = jnp.transpose(x, (0, 2, 3, 1)).reshape(B, T, 8 * F)

    # tiny per-utterance speaker-embedding projection (computed once, broadcast per tile)
    e_trans = _emb_proj(e, params["emb_w1"], params["emb_b1"],
                        params["emb_w2"], params["emb_b2"])          # (B, 8F) f32

    # fused feature mix + LSTM input projection (one big batch-parallel GEMM)
    hp, hp4 = dims["Hp"], 4 * dims["Hp"]
    xw = _xproj(y_t, e_trans, params["lstm_wih"], params["lstm_b"],
                _pick_tile(T, 256, 8), hp4)                          # (B, T, 4Hp) f32

    # uni-directional LSTM recurrence (chunked over time, h@Whh only)
    chunk = _pick_tile(T, lstm_chunk, 8)
    h = _lstm(xw, params["lstm_whh"], hp, chunk)                     # (B, T, Hp)

    # mask head + frontend non_linear (relu), fused with the mask application
    h_rows = h.reshape(B * T, hp)
    r_rows = jnp.transpose(r, (0, 2, 1)).reshape(B * T, F)
    i_rows = jnp.transpose(i, (0, 2, 1)).reshape(B * T, F)
    row_tile = _pick_tile(B * T, mlp_row_tile, 8)
    m_rows, ro_rows, io_rows = _mask_head(
        h_rows, params["mask_w1"], params["mask_b1"],
        params["mask_w2"], params["mask_b2"], r_rows, i_rows, row_tile)

    m = m_rows.reshape(B, T, F)
    if return_mask:
        return m
    r_out = ro_rows.reshape(B, T, F)
    i_out = io_rows.reshape(B, T, F)
    # TODO(synk): STFT.inverse (iSTFT) + peak normalization by `max_norm` not implemented
    #             (Stft / ComplexTensor are not part of the reference module).
    return r_out, i_out, m


# ----------------------------- demo -----------------------------------------

if __name__ == "__main__":
    key = jax.random.PRNGKey(0)
    B, T = 2, 8
    frame_len = 32
    N = 2 ** math.ceil(math.log2(frame_len))
    num_bins = N // 2 + 1          # 17
    emb_dim = 256

    k0, k1, k2, k3, k4 = jax.random.split(key, 5)
    r = jax.random.normal(k0, (B, num_bins, T), jnp.float32)
    i = jax.random.normal(k1, (B, num_bins, T), jnp.float32)
    e = jax.random.normal(k2, (B, emb_dim), jnp.float32)
    max_norm = jnp.abs(jax.random.normal(k3, (B, 1), jnp.float32))

    params = init_params(k4, num_bins, emb_dim=emb_dim, lstm_dim=400, linear_dim=600,
                         compute_dtype=jnp.bfloat16)

    r_out, i_out, mask = frontend_forward(params, r, i, e, max_norm)
    jax.block_until_ready((r_out, i_out, mask))

    assert r_out.shape == (B, T, num_bins)
    assert i_out.shape == (B, T, num_bins)
    assert mask.shape == (B, T, num_bins)
    assert bool(jnp.all(jnp.isfinite(r_out))) and bool(jnp.all(jnp.isfinite(i_out)))
    assert bool(jnp.all(mask >= 0.0))   # relu mask

    print("KERNEL_OK")
</pallas_src>

<mosaic_0001>
module attributes {stable_mosaic.version = 11 : i64} {
  func.func @mag_conv_f_kernel(%arg0: i32, %arg1: i32, %arg2: memref<1x23x8xf32, #tpu.memory_space<vmem>>, %arg3: memref<1x23x8xf32, #tpu.memory_space<vmem>>, %arg4: memref<7x64xf32, #tpu.memory_space<vmem>>, %arg5: memref<1x64xf32, #tpu.memory_space<vmem>>, %arg6: memref<1x64xf32, #tpu.memory_space<vmem>>, %arg7: memref<1x17x8x64xbf16, #tpu.memory_space<vmem>>) attributes {dimension_semantics = [#tpu.dimension_semantics<parallel>, #tpu.dimension_semantics<parallel>], iteration_bounds = array<i64: 2, 1>, scalar_prefetch = 0 : i64, scratch_operands = 0 : i64, tpu.core_type = #tpu.core_type<tc>, window_params = [{transform_indices = @transform_0, window_bounds = array<i64: 1, 23, 8>}, {transform_indices = @transform_1, window_bounds = array<i64: 1, 23, 8>}, {pipeline_mode = #tpu.pipeline_mode<synchronous>, transform_indices = @transform_2, window_bounds = array<i64: 7, 64>}, {pipeline_mode = #tpu.pipeline_mode<synchronous>, transform_indices = @transform_3, window_bounds = array<i64: 1, 64>}, {pipeline_mode = #tpu.pipeline_mode<synchronous>, transform_indices = @transform_4, window_bounds = array<i64: 1, 64>}, {transform_indices = @transform_5, window_bounds = array<i64: 1, 17, 8, 64>}]} {
    %c0 = arith.constant 0 : index
    %c0_0 = arith.constant 0 : index
    %c0_1 = arith.constant 0 : index
    %0 = vector.load %arg2[%c0, %c0_0, %c0_1] : memref<1x23x8xf32, #tpu.memory_space<vmem>>, vector<1x23x8xf32>
    %1 = vector.shape_cast %0 : vector<1x23x8xf32> to vector<23x8xf32>
    %c0_2 = arith.constant 0 : index
    %c0_3 = arith.constant 0 : index
    %c0_4 = arith.constant 0 : index
    %2 = vector.load %arg3[%c0_2, %c0_3, %c0_4] : memref<1x23x8xf32, #tpu.memory_space<vmem>>, vector<1x23x8xf32>
    %3 = vector.shape_cast %2 : vector<1x23x8xf32> to vector<23x8xf32>
    %4 = arith.mulf %1, %1 : vector<23x8xf32>
    %5 = arith.mulf %3, %3 : vector<23x8xf32>
    %6 = arith.addf %4, %5 : vector<23x8xf32>
    %7 = math.sqrt %6 : vector<23x8xf32>
    %cst = arith.constant 1.1920929E-7 : f32
    %8 = vector.broadcast %cst : f32 to vector<23x8xf32>
    %9 = arith.maximumf %7, %8 : vector<23x8xf32>
    %10 = tpu.iota {dimensions = array<i32: 0>} : vector<23x8xi32>
    %c3_i32 = arith.constant 3 : i32
    %11 = vector.broadcast %c3_i32 : i32 to vector<23x8xi32>
    %12 = arith.cmpi sge, %10, %11 : vector<23x8xi32>
    %c20_i32 = arith.constant 20 : i32
    %13 = vector.broadcast %c20_i32 : i32 to vector<23x8xi32>
    %14 = arith.cmpi slt, %10, %13 : vector<23x8xi32>
    %15 = arith.andi %12, %14 : vector<23x8xi1>
    %cst_5 = arith.constant 0.000000e+00 : f32
    %16 = vector.broadcast %cst_5 : f32 to vector<23x8xf32>
    %17 = arith.select %15, %9, %16 : vector<23x8xi1>, vector<23x8xf32>
    %cst_6 = arith.constant 0.000000e+00 : f32
    %18 = vector.broadcast %cst_6 : f32 to vector<17x8x64xf32>
    %19 = vector.extract_strided_slice %17 {offsets = [0, 0], sizes = [17, 8], strides = [1, 1]} : vector<23x8xf32> to vector<17x8xf32>
    %20 = vector.shape_cast %19 : vector<17x8xf32> to vector<17x8x1xf32>
    %c0_7 = arith.constant 0 : index
    %c0_8 = arith.constant 0 : index
    %21 = vector.load %arg4[%c0_7, %c0_8] : memref<7x64xf32, #tpu.memory_space<vmem>>, vector<1x64xf32>
    %22 = vector.shape_cast %21 : vector<1x64xf32> to vector<64xf32>
    %23 = vector.shape_cast %22 : vector<64xf32> to vector<1x1x64xf32>
    %24 = vector.broadcast %20 : vector<17x8x1xf32> to vector<17x8x64xf32>
    %25 = vector.broadcast %23 : vector<1x1x64xf32> to vector<17x8x64xf32>
    %26 = arith.mulf %24, %25 : vector<17x8x64xf32>
    %27 = arith.addf %18, %26 : vector<17x8x64xf32>
    %28 = vector.extract_strided_slice %17 {offsets = [1, 0], sizes = [17, 8], strides = [1, 1]} : vector<23x8xf32> to vector<17x8xf32>
    %29 = vector.shape_cast %28 : vector<17x8xf32> to vector<17x8x1xf32>
    %c1 = arith.constant 1 : index
    %c0_9 = arith.constant 0 : index
    %30 = vector.load %arg4[%c1, %c0_9] : memref<7x64xf32, #tpu.memory_space<vmem>>, vector<1x64xf32>
    %31 = vector.shape_cast %30 : vector<1x64xf32> to vector<64xf32>
    %32 = vector.shape_cast %31 : vector<64xf32> to vector<1x1x64xf32>
    %33 = vector.broadcast %29 : vector<17x8x1xf32> to vector<17x8x64xf32>
    %34 = vector.broadcast %32 : vector<1x1x64xf32> to vector<17x8x64xf32>
    %35 = arith.mulf %33, %34 : vector<17x8x64xf32>
    %36 = arith.addf %27, %35 : vector<17x8x64xf32>
    %37 = vector.extract_strided_slice %17 {offsets = [2, 0], sizes = [17, 8], strides = [1, 1]} : vector<23x8xf32> to vector<17x8xf32>
    %38 = vector.shape_cast %37 : vector<17x8xf32> to vector<17x8x1xf32>
    %c2 = arith.constant 2 : index
    %c0_10 = arith.constant 0 : index
    %39 = vector.load %arg4[%c2, %c0_10] : memref<7x64xf32, #tpu.memory_space<vmem>>, vector<1x64xf32>
    %40 = vector.shape_cast %39 : vector<1x64xf32> to vector<64xf32>
    %41 = vector.shape_cast %40 : vector<64xf32> to vector<1x1x64xf32>
    %42 = vector.broadcast %38 : vector<17x8x1xf32> to vector<17x8x64xf32>
    %43 = vector.broadcast %41 : vector<1x1x64xf32> to vector<17x8x64xf32>
    %44 = arith.mulf %42, %43 : vector<17x8x64xf32>
    %45 = arith.addf %36, %44 : vector<17x8x64xf32>
    %46 = vector.extract_strided_slice %17 {offsets = [3, 0], sizes = [17, 8], strides = [1, 1]} : vector<23x8xf32> to vector<17x8xf32>
    %47 = vector.shape_cast %46 : vector<17x8xf32> to vector<17x8x1xf32>
    %c3 = arith.constant 3 : index
    %c0_11 = arith.constant 0 : index
    %48 = vector.load %arg4[%c3, %c0_11] : memref<7x64xf32, #tpu.memory_space<vmem>>, vector<1x64xf32>
    %49 = vector.shape_cast %48 : vector<1x64xf32> to vector<64xf32>
    %50 = vector.shape_cast %49 : vector<64xf32> to vector<1x1x64xf32>
    %51 = vector.broadcast %47 : vector<17x8x1xf32> to vector<17x8x64xf32>
    %52 = vector.broadcast %50 : vector<1x1x64xf32> to vector<17x8x64xf32>
    %53 = arith.mulf %51, %52 : vector<17x8x64xf32>
    %54 = arith.addf %45, %53 : vector<17x8x64xf32>
    %55 = vector.extract_strided_slice %17 {offsets = [4, 0], sizes = [17, 8], strides = [1, 1]} : vector<23x8xf32> to vector<17x8xf32>
    %56 = vector.shape_cast %55 : vector<17x8xf32> to vector<17x8x1xf32>
    %c4 = arith.constant 4 : index
    %c0_12 = arith.constant 0 : index
    %57 = vector.load %arg4[%c4, %c0_12] : memref<7x64xf32, #tpu.memory_space<vmem>>, vector<1x64xf32>
    %58 = vector.shape_cast %57 : vector<1x64xf32> to vector<64xf32>
    %59 = vector.shape_cast %58 : vector<64xf32> to vector<1x1x64xf32>
    %60 = vector.broadcast %56 : vector<17x8x1xf32> to vector<17x8x64xf32>
    %61 = vector.broadcast %59 : vector<1x1x64xf32> to vector<17x8x64xf32>
    %62 = arith.mulf %60, %61 : vector<17x8x64xf32>
    %63 = arith.addf %54, %62 : vector<17x8x64xf32>
    %64 = vector.extract_strided_slice %17 {offsets = [5, 0], sizes = [17, 8], strides = [1, 1]} : vector<23x8xf32> to vector<17x8xf32>
    %65 = vector.shape_cast %64 : vector<17x8xf32> to vector<17x8x1xf32>
    %c5 = arith.constant 5 : index
    %c0_13 = arith.constant 0 : index
    %66 = vector.load %arg4[%c5, %c0_13] : memref<7x64xf32, #tpu.memory_space<vmem>>, vector<1x64xf32>
    %67 = vector.shape_cast %66 : vector<1x64xf32> to vector<64xf32>
    %68 = vector.shape_cast %67 : vector<64xf32> to vector<1x1x64xf32>
    %69 = vector.broadcast %65 : vector<17x8x1xf32> to vector<17x8x64xf32>
    %70 = vector.broadcast %68 : vector<1x1x64xf32> to vector<17x8x64xf32>
    %71 = arith.mulf %69, %70 : vector<17x8x64xf32>
    %72 = arith.addf %63, %71 : vector<17x8x64xf32>
    %73 = vector.extract_strided_slice %17 {offsets = [6, 0], sizes = [17, 8], strides = [1, 1]} : vector<23x8xf32> to vector<17x8xf32>
    %74 = vector.shape_cast %73 : vector<17x8xf32> to vector<17x8x1xf32>
    %c6 = arith.constant 6 : index
    %c0_14 = arith.constant 0 : index
    %75 = vector.load %arg4[%c6, %c0_14] : memref<7x64xf32, #tpu.memory_space<vmem>>, vector<1x64xf32>
    %76 = vector.shape_cast %75 : vector<1x64xf32> to vector<64xf32>
    %77 = vector.shape_cast %76 : vector<64xf32> to vector<1x1x64xf32>
    %78 = vector.broadcast %74 : vector<17x8x1xf32> to vector<17x8x64xf32>
    %79 = vector.broadcast %77 : vector<1x1x64xf32> to vector<17x8x64xf32>
    %80 = arith.mulf %78, %79 : vector<17x8x64xf32>
    %81 = arith.addf %72, %80 : vector<17x8x64xf32>
    %c0_15 = arith.constant 0 : index
    %c0_16 = arith.constant 0 : index
    %82 = vector.load %arg5[%c0_15, %c0_16] : memref<1x64xf32, #tpu.memory_space<vmem>>, vector<1x64xf32>
    %83 = vector.shape_cast %82 : vector<1x64xf32> to vector<64xf32>
    %84 = vector.shape_cast %83 : vector<64xf32> to vector<1x1x64xf32>
    %85 = vector.broadcast %84 : vector<1x1x64xf32> to vector<17x8x64xf32>
    %86 = arith.mulf %81, %85 : vector<17x8x64xf32>
    %c0_17 = arith.constant 0 : index
    %c0_18 = arith.constant 0 : index
    %87 = vector.load %arg6[%c0_17, %c0_18] : memref<1x64xf32, #tpu.memory_space<vmem>>, vector<1x64xf32>
    %88 = vector.shape_cast %87 : vector<1x64xf32> to vector<64xf32>
    %89 = vector.shape_cast %88 : vector<64xf32> to vector<1x1x64xf32>
    %90 = vector.broadcast %89 : vector<1x1x64xf32> to vector<17x8x64xf32>
    %91 = arith.addf %86, %90 : vector<17x8x64xf32>
    %cst_19 = arith.constant 0.000000e+00 : f32
    %92 = vector.broadcast %cst_19 : f32 to vector<17x8x64xf32>
    %93 = arith.maximumf %91, %92 : vector<17x8x64xf32>
    %94 = arith.truncf %93 : vector<17x8x64xf32> to vector<17x8x64xbf16>
    %c0_20 = arith.constant 0 : index
    %c0_21 = arith.constant 0 : index
    %c0_22 = arith.constant 0 : index
    %c0_23 = arith.constant 0 : index
    %95 = vector.load %arg7[%c0_20, %c0_21, %c0_22, %c0_23] : memref<1x17x8x64xbf16, #tpu.memory_space<vmem>>, vector<1x17x8x64xbf16>
    %96 = vector.shape_cast %95 : vector<1x17x8x64xbf16> to vector<17x8x64xbf16>
    %97 = vector.shape_cast %94 : vector<17x8x64xbf16> to vector<1x17x8x64xbf16>
    tpu.vector_store %arg7[%c0_20, %c0_21, %c0_22, %c0_23], %97 {strides = array<i32>} : memref<1x17x8x64xbf16, #tpu.memory_space<vmem>>, vector<1x17x8x64xbf16>,
    return
  }
  func.func @transform_0(%arg0: i32, %arg1: i32) -> (i32, i32, i32) {
    %c0_i32 = arith.constant 0 : i32
    %c0_i32_0 = arith.constant 0 : i32
    return %arg0, %c0_i32, %arg1 : i32, i32, i32
  }
  func.func @transform_1(%arg0: i32, %arg1: i32) -> (i32, i32, i32) {
    %c0_i32 = arith.constant 0 : i32
    %c0_i32_0 = arith.constant 0 : i32
    return %arg0, %c0_i32, %arg1 : i32, i32, i32
  }
  func.func @transform_2(%arg0: i32, %arg1: i32) -> (i32, i32) {
    %c0_i32 = arith.constant 0 : i32
    %c0_i32_0 = arith.constant 0 : i32
    %c0_i32_1 = arith.constant 0 : i32
    return %c0_i32, %c0_i32_0 : i32, i32
  }
  func.func @transform_3(%arg0: i32, %arg1: i32) -> (i32, i32) {
    %c0_i32 = arith.constant 0 : i32
    %c0_i32_0 = arith.constant 0 : i32
    %c0_i32_1 = arith.constant 0 : i32
    return %c0_i32, %c0_i32_0 : i32, i32
  }
  func.func @transform_4(%arg0: i32, %arg1: i32) -> (i32, i32) {
    %c0_i32 = arith.constant 0 : i32
    %c0_i32_0 = arith.constant 0 : i32
    %c0_i32_1 = arith.constant 0 : i32
    return %c0_i32, %c0_i32_0 : i32, i32
  }
  func.func @transform_5(%arg0: i32, %arg1: i32) -> (i32, i32, i32, i32) {
    %c0_i32 = arith.constant 0 : i32
    %c0_i32_0 = arith.constant 0 : i32
    %c0_i32_1 = arith.constant 0 : i32
    return %arg0, %c0_i32, %arg1, %c0_i32_0 : i32, i32, i32, i32
  }
}

</mosaic_0001>

<bundles_post_ra>
// kernel: tpu_custom_call.1
= control target key start
LH: loop header
LB: loop body
LE: loop exit
PB: predicated region body
PF: predicated region fallthrough
CT: control target
= control target key end

     0   :  { %10 = vsyncpa [#allocation3], 0  ;;  %s1683_s0 = inlined_call_operand.vmem [shape: f32[2,23,8], index: 0, kind: input, shape index: {}]   ;;  %s1684_s1 = inlined_call_operand.vmem [shape: f32[2,23,8], index: 1, kind: input, shape index: {}]   ;;  %s1685_s2 = inlined_call_operand.vmem [shape: f32[7,64], index: 2, kind: input, shape index: {}]   ;;  %s1686_s3 = inlined_call_operand.vmem [shape: f32[1,64], index: 3, kind: input, shape index: {}]   ;;  %s1687_s4 = inlined_call_operand.vmem [shape: f32[1,64], index: 4, kind: input, shape index: {}]   ;;  %s1688_s5 = inlined_call_operand.hbm [shape: bf16[2,17,8,64], index: 5, kind: output, shape index: {}]  }
   0x1   :  { %12 = vsyncpa [#allocation3 + $0x1], 0  ;;  %s1177_s18 = smov 0   ;;  %s1179_s19 = smov 0  }
   0x2   :  { %s1181_s20 = smov 0   ;;  %s1183_s21 = smov 0  }
   0x3   :  { %s1185_s22 = smov 0   ;;  %s1187_s23 = smov 0  }
   0x4 LB: > { %s979_s24 = sadd.s32 4294967295, %s1142_s23   ;;  %s980_s25 = sadd.s32 4294967294, %s1142_s23   ;;  %s1142_s23 = sphi %s1187_s23, %s18_s23   ;;  %s1138_s22 = sphi %s1185_s22, %s1724_s22   ;;  %s1134_s21 = sphi %s1183_s21, %s1723_s21   ;;  %s1130_s20 = sphi %s1181_s20, %s1722_s20   ;;  %s1126_s19 = sphi %s1179_s19, %s1721_s19   ;;  %s1122_s18 = sphi %s1177_s18, %s1720_s18  }
   0x5   : > { %s30_s26 = sadd.s32 1, %s1138_s22  ;;  %s158_s27 = sadd.s32 1, %s1130_s20 }
   0x6   : > { %p32_p0 = scmp.ge.s32.totalorder %s30_s26, 2  ;;  %p168_p1 = scmp.ne.s32.totalorder %s1130_s20, %s1126_s19 }
   0x7   : > { %p169_p2 = scmp.eq.s32.totalorder %s979_s24, 1  ;;  %p174_p3 = scmp.ne.s32.totalorder %s1126_s19, %s1122_s18 }
   0x8   : > { %s1726_s26 = smov (%p32_p0, %s30_s26), 0  ;;  %p175_p5 = scmp.eq.s32.totalorder %s980_s25, 1 }
   0x9   : > { %p1217_p4 = por %p169_p2, %p168_p1  ;;  %s153_s29 = ssub.s32 %s1138_s22, %s1726_s26 }
   0xa   : > { %p983_p6 = scmp.ge.s32.totalorder %s1142_s23, 1  ;;  %p156_p7 = scmp.eq.s32.totalorder %s153_s29, 0 }
   0xb   : > { %p1224_p8 = por %p175_p5, %p174_p3  ;;  %p224_p9 = scmp.lt.s32.totalorder %s1142_s23, 3 }
   0xc   : > { %s1230_s6 = scalar_select %p156_p7, %s1130_s20, %s158_s27  }
   0xd   : > { %p225_p10 = pnand %p983_p6, %p224_p9 }
   0xf   : > { %228 = sbr.rel (%p225_p10) target bundleno = 268 (0x10c), region = 40 }
  0x16   : > { %p263_p11 = scmp.lt.s32.totalorder %s1134_s21, 1  ;;  %v318_v10 = vlaneseq  ;;  %vm850_vm8 = vcmask 519168   ;;  %s260_s16 = sand.u32 1, %s1126_s19  }
  0x17   : > { %s1453_s25 = smul.u32 68, %s260_s16  ;;  %s1144_s12 = smov [#allocation2]  }
  0x18   : > { %s264_s7 = scalar_select %p263_p11, %s1134_s21, 1  ;;  %v1240_v13 = vshrl.u32 %v318_v10, 7 }
  0x19   : > { %s1475_s27 = scalar_lea.vmem [#allocation2], %s1453_s25  ;;  %s1000_s29 = smul.u32 1088, %s1134_s21 }
  0x1a   : > { %s999_s8 = smul.u32 24, %s264_s7  ;;  %v1243_v21 = vsub.s32 1, %v1240_v13  ;;  %v1246_v22 = vsub.s32 0, %v1240_v13  ;;  %v1249_v27 = vsub.s32 3, %v1240_v13  ;;  %v1252_v28 = vsub.s32 2, %v1240_v13  ;;  %s883_s7 = sshll.u32 %s1475_s27, 4  ;;  %s1624_s7 = int_to_ptr.vmem [resolvable:$true] %s883_s7 }
  0x1b   : > { %v371_v35 = vsub.s32 5, %v1240_v13  ;;  %v364_v36 = vsub.s32 4, %v1240_v13  ;;  %v385_v40 = vsub.s32 7, %v1240_v13  ;;  %v378_v41 = vsub.s32 6, %v1240_v13  ;;  %s1629_s10 = scalar_lea.hbm %s1688_s5, %s1000_s29  ;;  %s1637_s21 = scalar_lea.sflag [#allocation3], %s260_s16 }
  0x1c   : > { %s270_s11 = scalar_lea.vmem %s1683_s0, %s999_s8  ;;  %s278_s14 = scalar_lea.vmem %s1684_s1, %s999_s8  ;;  %vm322_vm4 = vcmp.ge.s32.totalorder %v1240_v13, 3  ;;  %v321_v55 = vadd.s32 16, %v1240_v13 }
  0x1d   : > { %v280_v0 = vld [vmem:[%s270_s11 + $0x8] sm:$0xff]  ;;  %v279_v2 = vld [vmem:[%s270_s11] sm:$0xff]  ;;  %v281_v11 = vld [vmem:[%s270_s11 + $0x10] sm:$0x7f]  ;;  %s1064_s11 = scalar_lea.vmem %s1624_s7, 1088  ;;  %s1068_s13 = sshll.u32 %s1144_s12, 4  ;;  %s1069_s13 = int_to_ptr.vmem [resolvable:$false] %s1068_s13 }
  0x1e   : > { %v283_v1 = vld [vmem:[%s278_s14 + $0x8] sm:$0xff]  ;;  %v286_v3 = vmul.f32 %v280_v0, %v280_v0  ;;  %v282_v5 = vld [vmem:[%s278_s14] sm:$0xff]  ;;  %v285_v6 = vmul.f32 %v279_v2, %v279_v2  ;;  %v284_v12 = vld [vmem:[%s278_s14 + $0x10] sm:$0x7f]  ;;  %v287_v14 = vmul.f32 %v281_v11, %v281_v11  ;;  %vm327_vm7 = vcmp.lt.s32.totalorder %v321_v55, 20  ;;  %p1065_p12 = scmp.ne.s32.totalorder %s1624_s7, %s1064_s11  ;;  %s1070_s14 = scalar_lea.vmem %s1069_s13, 2176 }
  0x1f   : > { %v289_v4 = vmul.f32 %v283_v1, %v283_v1  ;;  %v288_v7 = vmul.f32 %v282_v5, %v282_v5  ;;  %v290_v15 = vmul.f32 %v284_v12, %v284_v12  ;;  %v1275_v5 = vld [vmem:[%s1685_s2 + $0x1] ss:$0 sm:$0xff]  ;;  %v1291_v11 = vld [vmem:[%s1685_s2 + $0x3] ss:$0 sm:$0xff]  ;;  %v1296_v12 = vld [vmem:[%s1685_s2 + $0x4] ss:$0 sm:$0xff]  ;;  %p1071_p1 = scmp.lt.s32.totalorder %s1624_s7, %s1069_s13  ;;  %p1072_p2 = scmp.lt.s32.totalorder %s1070_s14, %s1064_s11 }
  0x20   : > { %1700 = vst [vmem:[#allocation7_spill] sm:$0xff] %v1291_v11  ;;  %p1066_p13 = pnand %p1065_p12, %p1217_p4 }
  0x21   : > { %v292_v8 = vadd.f32 %v289_v4, %v286_v3  ;;  %v291_v9 = vadd.f32 %v288_v7, %v285_v6  ;;  %v293_v23 = vadd.f32 %v290_v15, %v287_v14  ;;  %v1280_v6 = vld [vmem:[%s1685_s2] ss:$0 sm:$0xff]  ;;  %v1302_v14 = vld [vmem:[%s1685_s2 + $0x5] ss:$0 sm:$0xff]  ;;  %v1307_v15 = vld [vmem:[%s1685_s2 + $0x6] ss:$0 sm:$0xff]  ;;  %p1073_p3 = por %p1072_p2, %p1071_p1 }
  0x22   : > { %1698 = vst [vmem:[#allocation5_spill] sm:$0xff] %v1280_v6  ;;  %p1067_p0 = pneg %p1066_p13 }
  0x23   : > { %1058 = vrsqrt.f32 %v292_v8  ;;  %vm303_vm0 = vcmp.eq.f32.partialorder %v292_v8, inf  ;;  %v306_v17 = vand.u32 2147483648, %v292_v8  ;;  %vm305_vm1 = vcmp.eq.f32.partialorder %v292_v8, 0.0 }
  0x24   : > { %1060 = vrsqrt.f32 %v291_v9  ;;  %vm296_vm2 = vcmp.eq.f32.partialorder %v291_v9, inf  ;;  %v299_v31 = vand.u32 2147483648, %v291_v9  ;;  %vm298_vm3 = vcmp.eq.f32.partialorder %v291_v9, 0.0  ;;  %p1074_p5 = pnand %p1073_p3, %p1067_p0 }
  0x25   : > { %1062 = vrsqrt.f32 %v293_v23  ;;  %vm310_vm5 = vcmp.eq.f32.partialorder %v293_v23, inf  ;;  %v313_v50 = vand.u32 2147483648, %v293_v23  ;;  %vm312_vm6 = vcmp.eq.f32.partialorder %v293_v23, 0.0 }
  0x2d   : > { %v1059_v16 = vpop.eup %1058 }
  0x2e   : > { %v1061_v18 = vpop.eup %1060  ;;  %v302_v19 = vmul.f32 %v1059_v16, %v292_v8 }
  0x2f   : > { %v295_v25 = vmul.f32 %v1061_v18, %v291_v9  ;;  %v1063_v43 = vpop.eup %1062 }
  0x30   : > { %v304_v20 = vsel %vm303_vm0, %v292_v8, %v302_v19  ;;  %v309_v47 = vmul.f32 %v1063_v43, %v293_v23 }
  0x31   : > { %v307_v24 = vsel %vm305_vm1, %v306_v17, %v304_v20  ;;  %v297_v32 = vsel %vm296_vm2, %v291_v9, %v295_v25  ;;  %v1285_v9 = vld [vmem:[%s1685_s2 + $0x2] ss:$0 sm:$0xff] }
  0x32   : > { %v316_v26 = vmax.f32 %v307_v24, 1.1920929e-07  ;;  %v300_v37 = vsel %vm298_vm3, %v299_v31, %v297_v32  ;;  %v311_v51 = vsel %vm310_vm5, %v293_v23, %v309_v47  ;;  %1699 = vst [vmem:[#allocation6_spill] sm:$0xff] %v1285_v9 }
  0x33   : > { %v315_v42 = vmax.f32 %v300_v37, 1.1920929e-07  ;;  %v314_v54 = vsel %vm312_vm6, %v313_v50, %v311_v51 }
  0x34   : > { %v400_v29 = vrot.slane %v316_v26, %v1243_v21  ;;  %v393_v30 = vrot.slane %v316_v26, %v1246_v22  ;;  %v414_v33 = vrot.slane %v316_v26, %v1249_v27  ;;  %v407_v34 = vrot.slane %v316_v26, %v1252_v28 }
  0x35   : > { %v428_v38 = vrot.slane %v316_v26, %v371_v35  ;;  %v421_v39 = vrot.slane %v316_v26, %v364_v36  ;;  %v442_v44 = vrot.slane %v316_v26, %v385_v40  ;;  %v435_v45 = vrot.slane %v316_v26, %v378_v41 }
  0x36   : > { %402 = vbcast.lane.b32.xlu1 %v400_v29, 256  ;;  %395 = vbcast.lane.b32.xlu0 %v393_v30, 256  ;;  %v331_v46 = vsel %vm322_vm4, %v315_v42, 0.0  ;;  %v317_v58 = vmax.f32 %v314_v54, 1.1920929e-07 }
  0x37   : > { %v351_v48 = vrot.slane %v331_v46, %v1252_v28  ;;  %v337_v49 = vrot.slane %v331_v46, %v1246_v22  ;;  %v358_v52 = vrot.slane %v331_v46, %v1249_v27  ;;  %v344_v53 = vrot.slane %v331_v46, %v1243_v21 }
  0x38   : > { %v372_v56 = vrot.slane %v331_v46, %v371_v35  ;;  %v365_v57 = vrot.slane %v331_v46, %v364_v36  ;;  %v386_v59 = vrot.slane %v331_v46, %v385_v40  ;;  %v379_v60 = vrot.slane %v331_v46, %v378_v41 }
  0x39   : > { %v333_v61 = vsel %vm327_vm7, %v317_v58, 0.0 }
  0x3a   : > { %416 = vbcast.lane.b32.xlu1 %v414_v33, 256  ;;  %409 = vbcast.lane.b32.xlu0 %v407_v34, 256  ;;  %v495_v62 = vrot.slane %v333_v61, %v1243_v21  ;;  %v449_v63 = vrot.slane %v333_v61, %v1246_v22  ;;  %v541_v0 = vrot.slane %v333_v61, %v1252_v28 }
  0x3b   : > { %v587_v1 = vrot.slane %v333_v61, %v1249_v27  ;;  %v633_v2 = vrot.slane %v333_v61, %v364_v36  ;;  %v679_v3 = vrot.slane %v333_v61, %v371_v35  ;;  %v725_v4 = vrot.slane %v333_v61, %v378_v41 }
  0x3e   : > { %430 = vbcast.lane.b32.xlu1 %v428_v38, 256  ;;  %423 = vbcast.lane.b32.xlu0 %v421_v39, 256 }
  0x42   : > { %444 = vbcast.lane.b32.xlu1 %v442_v44, 256  ;;  %437 = vbcast.lane.b32.xlu0 %v435_v45, 256 }
  0x46   : > { %353 = vbcast.lane.b32.xlu1 %v351_v48, 256  ;;  %339 = vbcast.lane.b32.xlu0 %v337_v49, 256 }
  0x4a   : > { %360 = vbcast.lane.b32.xlu1 %v358_v52, 256  ;;  %346 = vbcast.lane.b32.xlu0 %v344_v53, 256 }
  0x4e   : > { %374 = vbcast.lane.b32.xlu1 %v372_v56, 256  ;;  %367 = vbcast.lane.b32.xlu0 %v365_v57, 256 }
  0x52   : > { %388 = vbcast.lane.b32.xlu1 %v386_v59, 256  ;;  %381 = vbcast.lane.b32.xlu0 %v379_v60, 256 }
  0x56   : > { %497 = vbcast.lane.b32.xlu1 %v495_v62, 256  ;;  %451 = vbcast.lane.b32.xlu0 %v449_v63, 256 }
  0x5a   : > { %543 = vbcast.lane.b32.xlu0 %v541_v0, 256  ;;  %589 = vbcast.lane.b32.xlu1 %v587_v1, 256 }
  0x5e   : > { %635 = vbcast.lane.b32.xlu0 %v633_v2, 256  ;;  %681 = vbcast.lane.b32.xlu1 %v679_v3, 256 }
  0x62   : > { %727 = vbcast.lane.b32.xlu0 %v725_v4, 256 }
  0xa8   : > { %v403_v7 = vpop.permute.xlu1 %402  ;;  %v396_v8 = vpop.permute.xlu0 %395 }
  0xa9   : > { %v512_v10 = vmul.f32 %v1275_v5, %v403_v7  ;;  %v466_v13 = vmul.f32 %v1280_v6, %v396_v8  ;;  %v467_v16 = vmul.f32 %v1280_v6, %v403_v7  ;;  %v1311_v17 = vmul.f32 %v1285_v9, %v403_v7 }
  0xaa   : > { %v1314_v18 = vmul.f32 %v1291_v11, %v403_v7  ;;  %v1317_v19 = vmul.f32 %v1296_v12, %v403_v7  ;;  %v1320_v20 = vmul.f32 %v1302_v14, %v403_v7  ;;  %v1323_v21 = vmul.f32 %v1307_v15, %v403_v7 }
  0xab   : > { %v1326_v22 = vmul.f32 %v1275_v5, %v396_v8  ;;  %v1329_v23 = vmul.f32 %v1285_v9, %v396_v8  ;;  %v529_v26 = vadd.f32 %v512_v10, %v466_v13  ;;  %v1332_v27 = vmul.f32 %v1291_v11, %v396_v8 }
  0xac   : > { %v417_v24 = vpop.permute.xlu1 %416  ;;  %v410_v25 = vpop.permute.xlu0 %409  ;;  %v1335_v28 = vmul.f32 %v1296_v12, %v396_v8  ;;  %v1339_v30 = vmul.f32 %v1302_v14, %v396_v8  ;;  %v1342_v31 = vmul.f32 %v1307_v15, %v396_v8 }
  0xad   : > { %v514_v29 = vmul.f32 %v1275_v5, %v417_v24  ;;  %v469_v32 = vmul.f32 %v1280_v6, %v417_v24  ;;  %v468_v33 = vmul.f32 %v1280_v6, %v410_v25  ;;  %v559_v34 = vmul.f32 %v1285_v9, %v417_v24 }
  0xae   : > { %v604_v35 = vmul.f32 %v1291_v11, %v417_v24  ;;  %v513_v36 = vmul.f32 %v1275_v5, %v410_v25  ;;  %v558_v37 = vmul.f32 %v1285_v9, %v410_v25  ;;  %v1351_v38 = vmul.f32 %v1296_v12, %v417_v24 }
  0xaf   : > { %v1354_v39 = vmul.f32 %v1302_v14, %v417_v24  ;;  %v1357_v40 = vmul.f32 %v1307_v15, %v417_v24  ;;  %v1360_v41 = vmul.f32 %v1291_v11, %v410_v25  ;;  %v531_v45 = vadd.f32 %v514_v29, %v468_v33 }
  0xb0   : > { %v431_v42 = vpop.permute.xlu1 %430  ;;  %v424_v43 = vpop.permute.xlu0 %423  ;;  %v530_v44 = vadd.f32 %v513_v36, %v467_v16  ;;  %v575_v46 = vadd.f32 %v558_v37, %v529_v26  ;;  %v1363_v47 = vmul.f32 %v1296_v12, %v410_v25  ;;  %v1366_v48 = vmul.f32 %v1302_v14, %v410_v25 }
  0xb1   : > { %v1369_v49 = vmul.f32 %v1307_v15, %v410_v25  ;;  %v1372_v50 = vmul.f32 %v1280_v6, %v431_v42  ;;  %v516_v51 = vmul.f32 %v1275_v5, %v431_v42  ;;  %v651_v52 = vmul.f32 %v1296_v12, %v431_v42 }
  0xb2   : > { %v576_v53 = vadd.f32 %v559_v34, %v530_v44  ;;  %v621_v54 = vadd.f32 %v604_v35, %v575_v46  ;;  %v470_v55 = vmul.f32 %v1280_v6, %v424_v43  ;;  %v515_v56 = vmul.f32 %v1275_v5, %v424_v43 }
  0xb3   : > { %v560_v57 = vmul.f32 %v1285_v9, %v424_v43  ;;  %v605_v58 = vmul.f32 %v1291_v11, %v424_v43  ;;  %v650_v59 = vmul.f32 %v1296_v12, %v424_v43  ;;  %v561_v62 = vmul.f32 %v1285_v9, %v431_v42 }
  0xb4   : > { %v1381_v60 = vpop.permute.xlu1 %444  ;;  %v438_v61 = vpop.permute.xlu0 %437  ;;  %v606_v63 = vmul.f32 %v1291_v11, %v431_v42  ;;  %v696_v0 = vmul.f32 %v1302_v14, %v431_v42  ;;  %v1387_v1 = vmul.f32 %v1307_v15, %v431_v42  ;;  %v532_v2 = vadd.f32 %v515_v56, %v469_v32 }
  0xb5   : > { %1701 = vst [vmem:[#allocation8_spill] sm:$0xff] %v1381_v60  ;;  %v577_v3 = vadd.f32 %v560_v57, %v531_v45  ;;  %v622_v4 = vadd.f32 %v605_v58, %v576_v53  ;;  %v667_v7 = vadd.f32 %v650_v59, %v621_v54  ;;  %v533_v8 = vadd.f32 %v516_v51, %v470_v55 }
  0xb6   : > { %v1390_v10 = vmul.f32 %v1302_v14, %v424_v43  ;;  %v1393_v13 = vmul.f32 %v1307_v15, %v424_v43  ;;  %v1397_v16 = vmul.f32 %v1275_v5, %v1381_v60  ;;  %v1401_v24 = vmul.f32 %v1285_v9, %v1381_v60 }
  0xb7   : > { %v1405_v25 = vmul.f32 %v1291_v11, %v1381_v60  ;;  %v743_v26 = vmul.f32 %v1307_v15, %v1381_v60  ;;  %v668_v29 = vadd.f32 %v651_v52, %v622_v4  ;;  %v578_v34 = vadd.f32 %v561_v62, %v532_v2  ;;  %v1425_v52 = vld [vmem:[%s1686_s3] ss:$0 sm:$0xff] }
  0xb8   : > { %1702 = vst [vmem:[#allocation9_spill] sm:$0xff] %v1397_v16  ;;  %1703 = vst [vmem:[#allocation10_spill] sm:$0xff] %v1401_v24  ;;  %v354_v32 = vpop.permute.xlu1 %353  ;;  %v340_v33 = vpop.permute.xlu0 %339  ;;  %v623_v35 = vadd.f32 %v606_v63, %v577_v3  ;;  %v713_v36 = vadd.f32 %v696_v0, %v667_v7  ;;  %v562_v37 = vmul.f32 %v1285_v9, %v438_v61  ;;  %v1440_v63 = vld [vmem:[%s1687_s4] ss:$0 sm:$0xff] }
  0xb9   : > { %1704 = vst [vmem:[#allocation11_spill] sm:$0xff] %v1405_v25  ;;  %v607_v42 = vmul.f32 %v1291_v11, %v438_v61  ;;  %v652_v43 = vmul.f32 %v1296_v12, %v438_v61  ;;  %v697_v44 = vmul.f32 %v1302_v14, %v438_v61  ;;  %v742_v45 = vmul.f32 %v1307_v15, %v438_v61 }
  0xba   : > { %v1416_v46 = vmul.f32 %v1296_v12, %v1381_v60  ;;  %v1420_v51 = vmul.f32 %v1302_v14, %v1381_v60  ;;  %v1428_v53 = vmul.f32 %v1280_v6, %v438_v61  ;;  %v1431_v54 = vmul.f32 %v1275_v5, %v438_v61 }
  0xbb   : > { %v1434_v55 = vadd.f32 %v562_v37, %v533_v8  ;;  %v714_v56 = vadd.f32 %v697_v44, %v668_v29  ;;  %v759_v57 = vadd.f32 %v742_v45, %v713_v36  ;;  %v460_v58 = vmul.f32 %v1280_v6, %v354_v32 }
  0xbc   : > { %1705 = vst [vmem:[#allocation12_spill] sm:$0xff] %v1420_v51  ;;  %1706 = vst [vmem:[#allocation13_spill] sm:$0xff] %v1428_v53  ;;  %v361_v59 = vpop.permute.xlu1 %360  ;;  %v347_v62 = vpop.permute.xlu0 %346  ;;  %v1442_v0 = vadd.f32 %v607_v42, %v578_v34  ;;  %v1444_v2 = vadd.f32 %v652_v43, %v623_v35  ;;  %v505_v61 = vmul.f32 %v1275_v5, %v354_v32 }
  0xbd   : > { %1707 = vst [vmem:[#allocation14_spill] sm:$0xff] %v1434_v55  ;;  %v506_v3 = vmul.f32 %v1275_v5, %v361_v59  ;;  %v760_v4 = vadd.f32 %v743_v26, %v714_v56  ;;  %v783_v7 = vmul.f32 %v1425_v52, %v759_v57  ;;  %v550_v8 = vmul.f32 %v1285_v9, %v354_v32 }
  0xbe   : > { %1708 = vst [vmem:[#allocation15_spill] sm:$0xff] %v1444_v2  ;;  %v458_v29 = vmul.f32 %v1280_v6, %v340_v33  ;;  %v461_v36 = vmul.f32 %v1280_v6, %v361_v59  ;;  %v551_v34 = vmul.f32 %v1285_v9, %v361_v59  ;;  %v459_v35 = vmul.f32 %v1280_v6, %v347_v62 }
  0xbf   : > { %v504_v37 = vmul.f32 %v1275_v5, %v347_v62  ;;  %v784_v42 = vmul.f32 %v1425_v52, %v760_v4  ;;  %v807_v26 = vadd.f32 %v1440_v63, %v783_v7  ;;  %v523_v43 = vadd.f32 %v506_v3, %v460_v58 }
  0xc0   : > { %v596_v32 = vmul.f32 %v1291_v11, %v361_v59  ;;  %v375_v44 = vpop.permute.xlu1 %374  ;;  %v522_v45 = vadd.f32 %v505_v61, %v459_v35  ;;  %v368_v60 = vpop.permute.xlu0 %367 }
  0xc1   : > { %v521_v33 = vadd.f32 %v504_v37, %v458_v29  ;;  %v463_v56 = vmul.f32 %v1280_v6, %v375_v44  ;;  %v508_v57 = vmul.f32 %v1275_v5, %v375_v44  ;;  %v808_v16 = vadd.f32 %v1440_v63, %v784_v42 }
  0xc2   : > { %v824_v53 = vmax.f32 %v807_v26, 0.0  ;;  %v553_v62 = vmul.f32 %v1285_v9, %v375_v44  ;;  %v598_v4 = vmul.f32 %v1291_v11, %v375_v44  ;;  %v568_v58 = vadd.f32 %v551_v34, %v522_v45 }
  0xc3   : > { %v567_v7 = vadd.f32 %v550_v8, %v521_v33  ;;  %v643_v59 = vmul.f32 %v1296_v12, %v375_v44  ;;  %v688_v3 = vmul.f32 %v1302_v14, %v375_v44  ;;  %v825_v61 = vmax.f32 %v808_v16, 0.0 }
  0xc4   : > { %v841_v29 = vpack.c.bf16 %v824_v53, %v824_v53  ;;  %v462_v35 = vmul.f32 %v1280_v6, %v368_v60  ;;  %v507_v37 = vmul.f32 %v1275_v5, %v368_v60  ;;  %v389_v24 = vpop.permute.xlu1 %388  ;;  %v552_v26 = vmul.f32 %v1285_v9, %v368_v60 }
  0xc5   : > { %v613_v42 = vadd.f32 %v596_v32, %v567_v7  ;;  %v597_v25 = vmul.f32 %v1291_v11, %v368_v60  ;;  %v642_v55 = vmul.f32 %v1296_v12, %v368_v60  ;;  %v842_v8 = vpack.c.bf16 %v825_v61, %v825_v61  ;;  %v382_v7 = vpop.permute.xlu0 %381 }
  0xc6   : > { %859 = vst.msk [vmem:[%s1475_s27 + $0x20] sm:$0xf] %vm850_vm8, %v841_v29  ;;  %v524_v16 = vadd.f32 %v507_v37, %v461_v36  ;;  %v525_v53 = vadd.f32 %v508_v57, %v462_v35  ;;  %v465_v34 = vmul.f32 %v1280_v6, %v389_v24  ;;  %v569_v44 = vadd.f32 %v552_v26, %v523_v43 }
  0xc7   : > { %v614_v33 = vadd.f32 %v597_v25, %v568_v58  ;;  %v659_v32 = vadd.f32 %v642_v55, %v613_v42  ;;  %v510_v45 = vmul.f32 %v1275_v5, %v389_v24  ;;  %860 = vst.msk [vmem:[%s1475_s27 + $0x24] sm:$0xf] %vm850_vm8, %v842_v8  ;;  %v555_v51 = vmul.f32 %v1285_v9, %v389_v24 }
  0xc8   : > { %v570_v60 = vadd.f32 %v553_v62, %v524_v16  ;;  %v528_v61 = vadd.f32 %v1326_v22, %v465_v34  ;;  %v600_v2 = vmul.f32 %v1291_v11, %v389_v24  ;;  %v615_v29 = vadd.f32 %v598_v4, %v569_v44 }
  0xc9   : > { %v660_v36 = vadd.f32 %v643_v59, %v614_v33  ;;  %v705_v57 = vadd.f32 %v688_v3, %v659_v32  ;;  %v645_v35 = vmul.f32 %v1296_v12, %v389_v24  ;;  %v690_v55 = vmul.f32 %v1302_v14, %v389_v24 }
  0xca   : > { %v574_v25 = vadd.f32 %v1311_v17, %v528_v61  ;;  %v735_v43 = vmul.f32 %v1307_v15, %v389_v24  ;;  %v464_v58 = vmul.f32 %v1280_v6, %v382_v7  ;;  %v509_v62 = vmul.f32 %v1275_v5, %v382_v7 }
  0xcb   : > { %v554_v22 = vmul.f32 %v1285_v9, %v382_v7  ;;  %v599_v37 = vmul.f32 %v1291_v11, %v382_v7  ;;  %v644_v4 = vmul.f32 %v1296_v12, %v382_v7  ;;  %v689_v42 = vmul.f32 %v1302_v14, %v382_v7 }
  0xcc   : > { %v620_v59 = vadd.f32 %v1360_v41, %v574_v25  ;;  %v527_v3 = vadd.f32 %v510_v45, %v464_v58  ;;  %v734_v17 = vmul.f32 %v1307_v15, %v382_v7  ;;  %v526_v26 = vadd.f32 %v509_v62, %v463_v56 }
  0xcd   : > { %v571_v8 = vadd.f32 %v554_v22, %v525_v53  ;;  %v616_v24 = vadd.f32 %v599_v37, %v570_v60  ;;  %v661_v16 = vadd.f32 %v644_v4, %v615_v29  ;;  %v706_v33 = vadd.f32 %v689_v42, %v660_v36 }
  0xce   : > { %v666_v34 = vadd.f32 %v1351_v38, %v620_v59  ;;  %v573_v44 = vadd.f32 %v1329_v23, %v527_v3  ;;  %v751_v32 = vadd.f32 %v734_v17, %v705_v57  ;;  %v572_v61 = vadd.f32 %v555_v51, %v526_v26  ;;  %v498_v59 = vpop.permute.xlu1 %497  ;;  %v1710_v17 = vld [vmem:[#allocation12_spill] sm:$0xff] }
  0xcf   : > { %v617_v6 = vadd.f32 %v600_v2, %v571_v8  ;;  %v662_v11 = vadd.f32 %v645_v35, %v616_v24  ;;  %v707_v9 = vadd.f32 %v690_v55, %v661_v16  ;;  %v752_v25 = vadd.f32 %v735_v43, %v706_v33 }
  0xd0   : > { %v712_v41 = vadd.f32 %v1390_v10, %v666_v34  ;;  %v619_v45 = vadd.f32 %v1314_v18, %v573_v44  ;;  %v775_v56 = vmul.f32 %v1425_v52, %v751_v32  ;;  %v618_v53 = vadd.f32 %v1332_v27, %v572_v61  ;;  %v1711_v34 = vld [vmem:[#allocation14_spill] sm:$0xff]  ;;  %v1712_v44 = vld [vmem:[#allocation11_spill] sm:$0xff] }
  0xd1   : > { %v663_v7 = vadd.f32 %v1335_v28, %v617_v6  ;;  %v708_v38 = vadd.f32 %v1339_v30, %v662_v11  ;;  %v753_v23 = vadd.f32 %v1342_v31, %v707_v9  ;;  %v776_v60 = vmul.f32 %v1425_v52, %v752_v25 }
  0xd2   : > { %v758_v51 = vadd.f32 %v1387_v1, %v712_v41  ;;  %v665_v2 = vadd.f32 %v1363_v47, %v619_v45  ;;  %v799_v10 = vadd.f32 %v1440_v63, %v775_v56  ;;  %v664_v18 = vadd.f32 %v1317_v19, %v618_v53 }
  0xd3   : > { %v709_v29 = vadd.f32 %v1320_v20, %v663_v7  ;;  %v754_v27 = vadd.f32 %v1323_v21, %v708_v38  ;;  %v777_v6 = vmul.f32 %v1425_v52, %v753_v23  ;;  %v800_v28 = vadd.f32 %v1440_v63, %v776_v60  ;;  %v1713_v38 = vld [vmem:[#allocation6_spill] sm:$0xff] }
  0xd4   : > { %v782_v11 = vmul.f32 %v1425_v52, %v758_v51  ;;  %v711_v9 = vadd.f32 %v1354_v39, %v665_v2  ;;  %v816_v30 = vmax.f32 %v799_v10, 0.0  ;;  %v710_v31 = vadd.f32 %v1366_v48, %v664_v18  ;;  %v1714_v51 = vld [vmem:[#allocation7_spill] sm:$0xff] }
  0xd5   : > { %v755_v47 = vadd.f32 %v1369_v49, %v709_v29  ;;  %v778_v19 = vmul.f32 %v1425_v52, %v754_v27  ;;  %v801_v20 = vadd.f32 %v1440_v63, %v777_v6  ;;  %v817_v36 = vmax.f32 %v800_v28, 0.0  ;;  %v1527_v49 = vpop.permute.xlu0 %451  ;;  %v1715_v28 = vld [vmem:[#allocation10_spill] sm:$0xff] }
  0xd6   : > { %v806_v21 = vadd.f32 %v1440_v63, %v782_v11  ;;  %v757_v1 = vadd.f32 %v1393_v13, %v711_v9  ;;  %v833_v57 = vpack.c.bf16 %v816_v30, %v816_v30  ;;  %v756_v39 = vadd.f32 %v1357_v40, %v710_v31 }
  0xd7   : > { %v779_v35 = vmul.f32 %v1425_v52, %v755_v47  ;;  %v802_v48 = vadd.f32 %v1440_v63, %v778_v19  ;;  %v818_v55 = vmax.f32 %v801_v20, 0.0  ;;  %v534_v43 = vadd.f32 %v1431_v54, %v1372_v50  ;;  %v1709_v54 = vld [vmem:[#allocation15_spill] sm:$0xff] }
  0xd8   : > { %v823_v58 = vmax.f32 %v806_v21, 0.0  ;;  %v781_v62 = vmul.f32 %v1425_v52, %v757_v1  ;;  %v834_v13 = vpack.c.bf16 %v817_v36, %v817_v36  ;;  %851 = vst.msk [vmem:[%s1475_s27] sm:$0xf] %vm850_vm8, %v833_v57  ;;  %v780_v40 = vmul.f32 %v1425_v52, %v756_v39  ;;  %v590_v21 = vpop.permute.xlu1 %589 }
  0xd9   : > { %v803_v22 = vadd.f32 %v1440_v63, %v779_v35  ;;  %v819_v37 = vmax.f32 %v802_v48, 0.0  ;;  %v835_v4 = vpack.c.bf16 %v818_v55, %v818_v55  ;;  %v670_v50 = vadd.f32 %v1416_v46, %v1442_v0  ;;  %v544_v53 = vpop.permute.xlu0 %543  ;;  %v1716_v55 = vld [vmem:[#allocation13_spill] sm:$0xff] }
  0xda   : > { %v840_v3 = vpack.c.bf16 %v823_v58, %v823_v58  ;;  %v805_v42 = vadd.f32 %v1440_v63, %v781_v62  ;;  %852 = vst.msk [vmem:[%s1475_s27 + $0x4] sm:$0xf] %vm850_vm8, %v834_v13  ;;  %v715_v26 = vadd.f32 %v1710_v17, %v1709_v54  ;;  %v804_v8 = vadd.f32 %v1440_v63, %v780_v40 }
  0xdb   : > { %v820_v24 = vmax.f32 %v803_v22, 0.0  ;;  %v836_v16 = vpack.c.bf16 %v819_v37, %v819_v37  ;;  %853 = vst.msk [vmem:[%s1475_s27 + $0x8] sm:$0xf] %vm850_vm8, %v835_v4  ;;  %v625_v33 = vadd.f32 %v1712_v44, %v1711_v34  ;;  %v520_v61 = vmul.f32 %v1275_v5, %v498_v59 }
  0xdc   : > { %858 = vst.msk [vmem:[%s1475_s27 + $0x1c] sm:$0xf] %vm850_vm8, %v840_v3  ;;  %v822_v32 = vmax.f32 %v805_v42, 0.0  ;;  %v700_v46 = vmul.f32 %v1302_v14, %v498_v59  ;;  %v745_v0 = vmul.f32 %v1307_v15, %v498_v59  ;;  %v821_v41 = vmax.f32 %v804_v8, 0.0  ;;  %v1719_v8 = vld [vmem:[#allocation5_spill] sm:$0xff] }
  0xdd   : > { %v837_v45 = vpack.c.bf16 %v820_v24, %v820_v24  ;;  %854 = vst.msk [vmem:[%s1475_s27 + $0xc] sm:$0xf] %vm850_vm8, %v836_v16  ;;  %v654_v25 = vmul.f32 %v1296_v12, %v1527_v49  ;;  %v699_v56 = vmul.f32 %v1302_v14, %v1527_v49  ;;  %v565_v23 = vmul.f32 %v1713_v38, %v498_v59 }
  0xde   : > { %v839_v7 = vpack.c.bf16 %v822_v32, %v822_v32  ;;  %v609_v2 = vmul.f32 %v1714_v51, %v1527_v49  ;;  %v744_v60 = vmul.f32 %v1307_v15, %v1527_v49  ;;  %v838_v10 = vpack.c.bf16 %v821_v41, %v821_v41 }
  0xdf   : > { %855 = vst.msk [vmem:[%s1475_s27 + $0x10] sm:$0xf] %vm850_vm8, %v837_v45  ;;  %v610_v18 = vmul.f32 %v1714_v51, %v498_v59  ;;  %v716_v29 = vadd.f32 %v699_v56, %v670_v50  ;;  %v671_v27 = vadd.f32 %v654_v25, %v625_v33  ;;  %v655_v6 = vmul.f32 %v1296_v12, %v498_v59  ;;  %v636_v50 = vpop.permute.xlu0 %635 }
  0xe0   : > { %857 = vst.msk [vmem:[%s1475_s27 + $0x18] sm:$0xf] %vm850_vm8, %v839_v7  ;;  %v761_v11 = vadd.f32 %v744_v60, %v715_v26  ;;  %v746_v9 = vmul.f32 %v1307_v15, %v544_v53  ;;  %v580_v30 = vadd.f32 %v1715_v28, %v534_v43  ;;  %856 = vst.msk [vmem:[%s1475_s27 + $0x14] sm:$0xf] %vm850_vm8, %v838_v10  ;;  %v1717_v43 = vld [vmem:[#allocation9_spill] sm:$0xff]  ;;  %v1718_v26 = vld [vmem:[#allocation8_spill] sm:$0xff]  ;;  %v682_v7 = vpop.permute.xlu1 %681 }
  0xe1   : > { %v762_v31 = vadd.f32 %v745_v0, %v716_v29  ;;  %v717_v47 = vadd.f32 %v700_v46, %v671_v27  ;;  %v566_v19 = vmul.f32 %v1713_v38, %v544_v53  ;;  %v611_v20 = vmul.f32 %v1714_v51, %v544_v53 }
  0xe2   : > { %v785_v1 = vmul.f32 %v1425_v52, %v761_v11  ;;  %v656_v36 = vmul.f32 %v1296_v12, %v544_v53  ;;  %v701_v57 = vmul.f32 %v1302_v14, %v544_v53  ;;  %v626_v39 = vadd.f32 %v609_v2, %v580_v30 }
  0xe3   : > { %v786_v35 = vmul.f32 %v1425_v52, %v762_v31  ;;  %v763_v48 = vadd.f32 %v746_v9, %v717_v47  ;;  %v535_v58 = vadd.f32 %v1717_v43, %v1716_v55  ;;  %v564_v62 = vmul.f32 %v1713_v38, %v1527_v49 }
  0xe4   : > { %v809_v13 = vadd.f32 %v1440_v63, %v785_v1  ;;  %v612_v40 = vmul.f32 %v1714_v51, %v590_v21  ;;  %v672_v22 = vadd.f32 %v655_v6, %v626_v39  ;;  %v747_v37 = vmul.f32 %v1307_v15, %v590_v21 }
  0xe5   : > { %v810_v4 = vadd.f32 %v1440_v63, %v786_v35  ;;  %v787_v59 = vmul.f32 %v1425_v52, %v763_v48  ;;  %v702_v3 = vmul.f32 %v1302_v14, %v590_v21  ;;  %v581_v42 = vadd.f32 %v564_v62, %v535_v58 }
  0xe6   : > { %v826_v54 = vmax.f32 %v809_v13, 0.0  ;;  %v718_v17 = vadd.f32 %v701_v57, %v672_v22  ;;  %v473_v24 = vmul.f32 %v1719_v8, %v1718_v26  ;;  %v474_v16 = vmul.f32 %v1719_v8, %v1527_v49 }
  0xe7   : > { %v827_v34 = vmax.f32 %v810_v4, 0.0  ;;  %v811_v44 = vadd.f32 %v1440_v63, %v787_v59  ;;  %v627_v33 = vadd.f32 %v610_v18, %v581_v42  ;;  %v519_v32 = vmul.f32 %v1275_v5, %v1527_v49  ;;  %v728_v18 = vpop.permute.xlu0 %727 }
  0xe8   : > { %v843_v46 = vpack.c.bf16 %v826_v54, %v826_v54  ;;  %v764_v0 = vadd.f32 %v747_v37, %v718_v17  ;;  %v748_v41 = vmul.f32 %v1307_v15, %v636_v50  ;;  %v537_v45 = vadd.f32 %v520_v61, %v474_v16 }
  0xe9   : > { %v844_v25 = vpack.c.bf16 %v827_v34, %v827_v34  ;;  %v828_v56 = vmax.f32 %v811_v44, 0.0  ;;  %v673_v53 = vadd.f32 %v656_v36, %v627_v33  ;;  %v536_v38 = vadd.f32 %v519_v32, %v473_v24 }
  0xea   : > { %861 = vst.msk [vmem:[%s1475_s27 + $0x28] sm:$0xf] %vm850_vm8, %v843_v46  ;;  %v788_v51 = vmul.f32 %v1425_v52, %v764_v0  ;;  %v658_v2 = vmul.f32 %v1296_v12, %v636_v50  ;;  %v583_v60 = vadd.f32 %v566_v19, %v537_v45  ;;  %v657_v49 = vmul.f32 %v1296_v12, %v590_v21 }
  0xeb   : > { %862 = vst.msk [vmem:[%s1475_s27 + $0x2c] sm:$0xf] %vm850_vm8, %v844_v25  ;;  %v845_v5 = vpack.c.bf16 %v828_v56, %v828_v56  ;;  %v719_v10 = vadd.f32 %v702_v3, %v673_v53  ;;  %v582_v61 = vadd.f32 %v565_v23, %v536_v38  ;;  %v704_v6 = vmul.f32 %v1302_v14, %v682_v7 }
  0xec   : > { %v812_v29 = vadd.f32 %v1440_v63, %v788_v51  ;;  %v629_v27 = vadd.f32 %v612_v40, %v583_v60  ;;  %v703_v11 = vmul.f32 %v1302_v14, %v636_v50  ;;  %v750_v47 = vmul.f32 %v1307_v15, %v728_v18 }
  0xed   : > { %863 = vst.msk [vmem:[%s1475_s27 + $0x30] sm:$0xf] %vm850_vm8, %v845_v5  ;;  %v765_v9 = vadd.f32 %v748_v41, %v719_v10  ;;  %v628_v28 = vadd.f32 %v611_v20, %v582_v61  ;;  %v749_v19 = vmul.f32 %v1307_v15, %v682_v7 }
  0xee   : > { %v829_v30 = vmax.f32 %v812_v29, 0.0  ;;  %v675_v31 = vadd.f32 %v658_v2, %v629_v27 }
  0xef   : > { %v789_v12 = vmul.f32 %v1425_v52, %v765_v9  ;;  %v674_v23 = vadd.f32 %v657_v49, %v628_v28 }
  0xf0   : > { %v846_v21 = vpack.c.bf16 %v829_v30, %v829_v30  ;;  %v721_v1 = vadd.f32 %v704_v6, %v675_v31 }
  0xf1   : > { %v813_v36 = vadd.f32 %v1440_v63, %v789_v12  ;;  %v720_v57 = vadd.f32 %v703_v11, %v674_v23 }
  0xf2   : > { %864 = vst.msk [vmem:[%s1475_s27 + $0x34] sm:$0xf] %vm850_vm8, %v846_v21  ;;  %v767_v14 = vadd.f32 %v750_v47, %v721_v1 }
  0xf3   : > { %v830_v20 = vmax.f32 %v813_v36, 0.0  ;;  %v766_v39 = vadd.f32 %v749_v19, %v720_v57 }
  0xf4   : > { %v791_v35 = vmul.f32 %v1425_v52, %v767_v14 }
  0xf5   : > { %v847_v48 = vpack.c.bf16 %v830_v20, %v830_v20  ;;  %v790_v55 = vmul.f32 %v1425_v52, %v766_v39 }
  0xf6   : > { %v815_v15 = vadd.f32 %v1440_v63, %v791_v35 }
  0xf7   : > { %865 = vst.msk [vmem:[%s1475_s27 + $0x38] sm:$0xf] %vm850_vm8, %v847_v48  ;;  %v814_v43 = vadd.f32 %v1440_v63, %v790_v55 }
  0xf8   : > { %v832_v58 = vmax.f32 %v815_v15, 0.0 }
  0xf9   : > { %v831_v62 = vmax.f32 %v814_v43, 0.0 }
  0xfa   : > { %v849_v13 = vpack.c.bf16 %v832_v58, %v832_v58 }
  0xfb   : > { %v848_v40 = vpack.c.bf16 %v831_v62, %v831_v62 }
  0xfc   : > { %867 = vst.msk [vmem:[%s1475_s27 + $0x40] sm:$0xf] %vm850_vm8, %v849_v13 }
  0xfd   : > { %866 = vst.msk [vmem:[%s1475_s27 + $0x3c] sm:$0xf] %vm850_vm8, %v848_v40 }
  0xfe   : > { %1077 = shalt.err (!%p1074_p5)
}
  0xff   : > { %s1078_s15 = scalar_lea.hbm %s1629_s10, 1088  ;;  %s1082_s24 = scalar_lea.hbm %s1688_s5, 2176 }
 0x100   : > { %p1079_p6 = scmp.ne.s32.totalorder %s1629_s10, %s1078_s15  ;;  %p1083_p10 = scmp.lt.u32.totalorder %s1629_s10, %s1688_s5 }
 0x101   : > { %p1084_p11 = scmp.lt.u32.totalorder %s1082_s24, %s1078_s15  ;;  %p1086_p13 = scmp.lt.u32.totalorder %s1078_s15, %s1629_s10 }
 0x102   : > { %p1080_p7 = pnand %p1079_p6, %p1217_p4 }
 0x103   : > { %p1085_p12 = por %p1084_p11, %p1083_p10 }
 0x104   : > { %p1081_p9 = pneg %p1080_p7 }
 0x105   : > { %p1087_p0 = por %p1086_p13, %p1085_p12 }
 0x107   : > { %p1088_p1 = pnand %p1087_p0, %p1081_p9 }
 0x109   : > { %1091 = shalt.err (!%p1088_p1)
}
 0x10a   : > { %s1145_s29 = smov 64   ;;  %s1146_s8 = smov 4  }
 0x10b   : > { %1001 = dma.vmem_to_hbm [thread:$0]  (%p1217_p4), %s1624_s7, 1088, %s1629_s10, %s1637_s21, %s1145_s29, %s1145_s29, %s1146_s8  }
 0x10c PF: > { %p1007_p2 = scmp.ge.s32.totalorder %s1142_s23, 2  ;;  %s898_s9 = sand.u32 1, %s1122_s18  }
 0x10d   : > { %s899_s11 = scalar_lea.sflag [#allocation3], %s898_s9 }
 0x10e   : > { %p1004_p3 = pnand %p1007_p2, %p1224_p8 }
 0x110   : > { %1117 = dma.done.wait (!%p1004_p3), %s899_s11, 1088  }
 0x111   : > { %1119 = vsyncadd (!%p1004_p3), %s899_s11, 4294966208  ;;  %s18_s23 = sadd.s32 1, %s1142_s23   ;;  %s1720_s18 = smov %s1126_s19 }
 0x112   : > { %p15_p5 = scmp.ge.s32.totalorder %s18_s23, 4   ;;  %s1721_s19 = smov %s1130_s20 }
 0x113   : > { %s1722_s20 = smov %s1230_s6  ;;  %s1723_s21 = smov %s1138_s22 }
 0x114   : > { %s1724_s22 = smov %s1726_s26  ;;  %17 = sbr.rel (!%p15_p5) target bundleno = 4 (0x4), region = 78 }
 0x11b   :  { %904 = vsyncpa [#allocation3], 1 }
 0x11c   :  { %906 = vsyncpa [#allocation3 + $0x1], 1 }

</bundles_post_ra>
